<compile_context>
chip_gen: v7x
topology: tpu7x:2x2x1
jax: 0.10.0
libtpu: 0.0.40
codegen_flags: <defaults>
</compile_context>

<pallas_src>
import functools
import math

import jax
import jax.numpy as jnp
from jax import lax
from jax.experimental import pallas as pl
from jax.experimental.pallas import tpu as pltpu


def _round_up(x, m):
    return (x + m - 1) // m * m


# ---------------------------------------------------------------------------
# Single-cell kernel: one forward(input, hidden) call.  No grid, everything
# VMEM-resident, two natural-shaped outputs (no padded slab / masking).
# ---------------------------------------------------------------------------
def _rnn_cell_kernel(x_ref, h_ref, wxh_ref, whh_ref, wxo_ref, who_ref,
                     bh_ref, bo_ref, out_ref, hid_ref):
    x = x_ref[...]
    h = h_ref[...]
    yh = jnp.dot(x, wxh_ref[...], preferred_element_type=jnp.float32)
    yh = yh + jnp.dot(h, whh_ref[...], preferred_element_type=jnp.float32)
    yh = yh + bh_ref[...]
    hid_ref[...] = jnp.maximum(yh, 0.01 * yh)            # LeakyReLU(0.01)
    yo = jnp.dot(x, wxo_ref[...], preferred_element_type=jnp.float32)
    yo = yo + jnp.dot(h, who_ref[...], preferred_element_type=jnp.float32)
    out_ref[...] = yo + bo_ref[...]


# ---------------------------------------------------------------------------
# Bulk projection kernels (run once per sequence, not per step).
#   _proj_kernel : y = a @ w + b            (input -> hidden pre-projection)
#   _proj2_kernel: y = a @ wa + c @ wc + b  (deferred i2o output projection)
# Demo sizes are tiny so the whole GEMM is VMEM-resident; for long sequences
# one would add a grid over the M = T*B rows.
# ---------------------------------------------------------------------------
def _proj_kernel(a_ref, w_ref, b_ref, o_ref):
    y = jnp.dot(a_ref[...], w_ref[...], preferred_element_type=jnp.float32)
    o_ref[...] = y + b_ref[...]


def _proj2_kernel(a_ref, wa_ref, c_ref, wc_ref, b_ref, o_ref):
    y = jnp.dot(a_ref[...], wa_ref[...], preferred_element_type=jnp.float32)
    y = y + jnp.dot(c_ref[...], wc_ref[...], preferred_element_type=jnp.float32)
    o_ref[...] = y + b_ref[...]


# ---------------------------------------------------------------------------
# Recurrence kernel: grid=(T_pad // t_blk,) (sequential, "arbitrary").
# Per grid step it runs an UNROLLED fori_loop over t_blk timesteps:
#     hs[t]  = h_{t-1}                       (stored for the deferred i2o GEMM)
#     h_t    = LeakyReLU(z_t + h_{t-1} @ Whh)
# The hidden carry lives in a resident (B_pad, H) output block (constant
# index_map), initialized from h0 at the first grid step.  Whh and h0 are
# VMEM-resident across all grid steps.  Padded tail timesteps (when t_blk does
# not divide T) leave the carry untouched.
# ---------------------------------------------------------------------------
def _rnn_rec_kernel(z_ref, h0_ref, whh_ref, hs_ref, hid_ref, *,
                    t_blk, seq_len, mask_tail):
    blk = pl.program_id(0)

    @pl.when(blk == 0)
    def _():
        hid_ref[...] = h0_ref[...]

    whh = whh_ref[...]

    def body(i, h_prev):
        hs_ref[i] = h_prev                                # h_{t-1} for step t
        y = z_ref[i] + jnp.dot(h_prev, whh,
                               preferred_element_type=jnp.float32)
        h_new = jnp.maximum(y, 0.01 * y)                  # LeakyReLU(0.01)
        if mask_tail:                                     # static Python branch
            t = blk * t_blk + i
            h_new = jnp.where(t < seq_len, h_new, h_prev)
        return h_new

    hid_ref[...] = lax.fori_loop(0, t_blk, body, hid_ref[...], unroll=True)


# ---------------------------------------------------------------------------
# One-time parameter preparation (hoisted out of the per-step / per-call path):
# split the two Linear layers at the input/hidden boundary and transpose.
# ---------------------------------------------------------------------------
def prepare_params(w_i2h, b_i2h, w_i2o, b_i2o, input_size):
    I = input_size
    wxh = jnp.asarray(w_i2h[:, :I].T, jnp.float32)        # (I, H)
    whh = jnp.asarray(w_i2h[:, I:].T, jnp.float32)        # (H, H)
    wxo = jnp.asarray(w_i2o[:, :I].T, jnp.float32)        # (I, O)
    who = jnp.asarray(w_i2o[:, I:].T, jnp.float32)        # (H, O)
    b_h = jnp.asarray(b_i2h, jnp.float32).reshape(1, -1)  # (1, H)
    b_o = jnp.asarray(b_i2o, jnp.float32).reshape(1, -1)  # (1, O)
    return wxh, whh, wxo, who, b_h, b_o


def rnn_forward(x, hidden, wxh, whh, wxo, who, b_h, b_o):
    """Single-step equivalent of RNN.forward -> (output, hidden_new)."""
    B = x.shape[0]
    H = whh.shape[0]
    O = who.shape[1]
    vmem = pl.BlockSpec(memory_space=pltpu.MemorySpace.VMEM)
    output, hidden_new = pl.pallas_call(
        _rnn_cell_kernel,
        out_shape=(jax.ShapeDtypeStruct((B, O), jnp.float32),
                   jax.ShapeDtypeStruct((B, H), jnp.float32)),
        in_specs=[vmem] * 8,
        out_specs=(vmem, vmem),
    )(x, hidden, wxh, whh, wxo, who, b_h, b_o)
    return output, hidden_new


def rnn_forward_sequence(xs, h0, wxh, whh, wxo, who, b_h, b_o, *, t_blk=32):
    """Apply the cell over xs: (T, B, I).  Returns (outputs (T,B,O), h_final (B,H)).

    Stage A (bulk GEMM):  z_t = x_t @ Wxh + b_h for all t.
    Stage B (recurrence): h_t = LeakyReLU(z_t + h_{t-1} @ Whh), store all h_{t-1}.
    Stage C (bulk GEMM):  o_t = x_t @ Wxo + h_{t-1} @ Who + b_o for all t.
    """
    T, B, I = xs.shape
    H = whh.shape[0]
    O = who.shape[1]

    B_pad = max(8, _round_up(B, 8))        # fill vreg sublanes / MXU rows
    t_blk = max(1, min(t_blk, T))
    T_pad = _round_up(T, t_blk)
    mask_tail = (T_pad != T)

    x_pad = jnp.zeros((T_pad, B_pad, I), jnp.float32).at[:T, :B].set(xs)
    h0_pad = jnp.zeros((B_pad, H), jnp.float32).at[:B].set(h0)

    M = T_pad * B_pad
    x_flat = x_pad.reshape(M, I)
    vmem = pl.BlockSpec(memory_space=pltpu.MemorySpace.VMEM)

    # ---- Stage A: hoisted input->hidden projection (one GEMM for all t) ----
    z_flat = pl.pallas_call(
        _proj_kernel,
        out_shape=jax.ShapeDtypeStruct((M, H), jnp.float32),
        in_specs=[vmem] * 3,
        out_specs=vmem,
    )(x_flat, wxh, b_h)
    z = z_flat.reshape(T_pad, B_pad, H)

    # ---- Stage B: sequential recurrence, time-blocked grid ----
    rec_kernel = functools.partial(
        _rnn_rec_kernel, t_blk=t_blk, seq_len=T, mask_tail=mask_tail)
    hs_prev, hid_final = pl.pallas_call(
        rec_kernel,
        out_shape=(jax.ShapeDtypeStruct((T_pad, B_pad, H), jnp.float32),
                   jax.ShapeDtypeStruct((B_pad, H), jnp.float32)),
        grid_spec=pltpu.PrefetchScalarGridSpec(
            num_scalar_prefetch=0,
            grid=(T_pad // t_blk,),
            in_specs=[
                pl.BlockSpec((t_blk, B_pad, H), lambda b: (b, 0, 0)),  # z block
                pl.BlockSpec((B_pad, H), lambda b: (0, 0)),            # h0 (resident)
                pl.BlockSpec((H, H), lambda b: (0, 0)),                # Whh (resident)
            ],
            out_specs=[
                pl.BlockSpec((t_blk, B_pad, H), lambda b: (b, 0, 0)),  # h_{t-1} seq
                pl.BlockSpec((B_pad, H), lambda b: (0, 0)),            # hidden carry
            ],
        ),
        compiler_params=pltpu.CompilerParams(
            dimension_semantics=("arbitrary",)),  # carried hidden: sequential
    )(z, h0_pad, whh)

    # ---- Stage C: deferred i2o output projection (one GEMM for all t) ----
    hs_flat = hs_prev.reshape(M, H)
    out_flat = pl.pallas_call(
        _proj2_kernel,
        out_shape=jax.ShapeDtypeStruct((M, O), jnp.float32),
        in_specs=[vmem] * 5,
        out_specs=vmem,
    )(x_flat, wxo, hs_flat, who, b_o)

    outputs = out_flat.reshape(T_pad, B_pad, O)[:T, :B]
    hidden_final = hid_final[:B]
    return outputs, hidden_final


def init_params(key, input_size, hidden_size, output_size, weight_std):
    """Deterministic parameter init matching the module's normal_() calls."""
    bias_std = math.sqrt(0.05)
    k1, k2, k3, k4 = jax.random.split(key, 4)
    D = input_size + hidden_size
    w_i2h = weight_std * jax.random.normal(k1, (hidden_size, D), jnp.float32)
    b_i2h = bias_std * jax.random.normal(k2, (hidden_size,), jnp.float32)
    w_i2o = weight_std * jax.random.normal(k3, (output_size, D), jnp.float32)
    b_i2o = bias_std * jax.random.normal(k4, (output_size,), jnp.float32)
    return w_i2h, b_i2h, w_i2o, b_i2o


if __name__ == "__main__":
    batch = 2
    input_size = 16
    hidden_size = 32
    output_size = 8
    seq_len = 8
    weight_std = 0.1

    key = jax.random.PRNGKey(0)
    kx, ks, kp = jax.random.split(key, 3)

    x = jax.random.normal(kx, (batch, input_size), jnp.float32)
    xs = jax.random.normal(ks, (seq_len, batch, input_size), jnp.float32)
    hidden0 = jnp.zeros((batch, hidden_size), jnp.float32)  # initHidden, batched

    w_i2h, b_i2h, w_i2o, b_i2o = init_params(
        kp, input_size, hidden_size, output_size, weight_std)

    # One-time (hoisted) weight split/transpose.
    wxh, whh, wxo, who, b_h, b_o = prepare_params(
        w_i2h, b_i2h, w_i2o, b_i2o, input_size)

    # ---- single step ----
    output, hidden_new = rnn_forward(x, hidden0, wxh, whh, wxo, who, b_h, b_o)
    jax.block_until_ready((output, hidden_new))

    combined = jnp.concatenate([x, hidden0], axis=1)
    ref_h = combined @ w_i2h.T + b_i2h
    ref_h = jnp.maximum(ref_h, 0.01 * ref_h)
    ref_o = combined @ w_i2o.T + b_i2o
    assert jnp.allclose(output, ref_o, atol=1e-5), "single-step output mismatch"
    assert jnp.allclose(hidden_new, ref_h, atol=1e-5), "single-step hidden mismatch"

    # ---- sequence reference ----
    h = hidden0
    ref_outs = []
    for t in range(seq_len):
        comb = jnp.concatenate([xs[t], h], axis=1)
        o = comb @ w_i2o.T + b_i2o
        h = comb @ w_i2h.T + b_i2h
        h = jnp.maximum(h, 0.01 * h)
        ref_outs.append(o)
    ref_outs = jnp.stack(ref_outs, axis=0)

    # ---- sequence: exact time blocking (grid of 2, carry across blocks) ----
    seq_out, seq_hid = rnn_forward_sequence(
        xs, hidden0, wxh, whh, wxo, who, b_h, b_o, t_blk=4)
    jax.block_until_ready((seq_out, seq_hid))
    assert jnp.allclose(seq_out, ref_outs, atol=1e-4), "sequence output mismatch"
    assert jnp.allclose(seq_hid, h, atol=1e-4), "sequence hidden mismatch"

    # ---- sequence: non-dividing block size (exercises the tail mask) ----
    seq_out3, seq_hid3 = rnn_forward_sequence(
        xs, hidden0, wxh, whh, wxo, who, b_h, b_o, t_blk=3)
    jax.block_until_ready((seq_out3, seq_hid3))
    assert jnp.allclose(seq_out3, ref_outs, atol=1e-4), "tail-masked output mismatch"
    assert jnp.allclose(seq_hid3, h, atol=1e-4), "tail-masked hidden mismatch"

    print("KERNEL_OK")
</pallas_src>

<mosaic_0001>
module attributes {stable_mosaic.version = 11 : i64} {
  func.func @_rnn_cell_kernel(%arg0: memref<2x16xf32, #tpu.memory_space<vmem>>, %arg1: memref<2x32xf32, #tpu.memory_space<vmem>>, %arg2: memref<16x32xf32, #tpu.memory_space<vmem>>, %arg3: memref<32x32xf32, #tpu.memory_space<vmem>>, %arg4: memref<16x8xf32, #tpu.memory_space<vmem>>, %arg5: memref<32x8xf32, #tpu.memory_space<vmem>>, %arg6: memref<1x32xf32, #tpu.memory_space<vmem>>, %arg7: memref<1x8xf32, #tpu.memory_space<vmem>>, %arg8: memref<2x8xf32, #tpu.memory_space<vmem>>, %arg9: memref<2x32xf32, #tpu.memory_space<vmem>>) attributes {dimension_semantics = [], scalar_prefetch = 0 : i64, scratch_operands = 0 : i64, tpu.core_type = #tpu.core_type<tc>} {
    %c0 = arith.constant 0 : index
    %c0_0 = arith.constant 0 : index
    %0 = vector.load %arg0[%c0, %c0_0] : memref<2x16xf32, #tpu.memory_space<vmem>>, vector<2x16xf32>
    %c0_1 = arith.constant 0 : index
    %c0_2 = arith.constant 0 : index
    %1 = vector.load %arg1[%c0_1, %c0_2] : memref<2x32xf32, #tpu.memory_space<vmem>>, vector<2x32xf32>
    %c0_3 = arith.constant 0 : index
    %c0_4 = arith.constant 0 : index
    %2 = vector.load %arg2[%c0_3, %c0_4] : memref<16x32xf32, #tpu.memory_space<vmem>>, vector<16x32xf32>
    %cst = arith.constant dense<0.000000e+00> : vector<2x32xf32>
    %3 = tpu.matmul %0, %2, %cst {dimension_numbers = #tpu.dot_dimension_numbers<[1], [0], [0], [1], [0, 0, 1, 1], [], []>} : vector<2x16xf32>, vector<16x32xf32>, vector<2x32xf32> -> vector<2x32xf32>
    %c0_5 = arith.constant 0 : index
    %c0_6 = arith.constant 0 : index
    %4 = vector.load %arg3[%c0_5, %c0_6] : memref<32x32xf32, #tpu.memory_space<vmem>>, vector<32x32xf32>
    %cst_7 = arith.constant dense<0.000000e+00> : vector<2x32xf32>
    %5 = tpu.matmul %1, %4, %cst_7 {dimension_numbers = #tpu.dot_dimension_numbers<[1], [0], [0], [1], [0, 0, 1, 1], [], []>} : vector<2x32xf32>, vector<32x32xf32>, vector<2x32xf32> -> vector<2x32xf32>
    %6 = arith.addf %3, %5 : vector<2x32xf32>
    %c0_8 = arith.constant 0 : index
    %c0_9 = arith.constant 0 : index
    %7 = vector.load %arg6[%c0_8, %c0_9] : memref<1x32xf32, #tpu.memory_space<vmem>>, vector<1x32xf32>
    %8 = vector.broadcast %7 : vector<1x32xf32> to vector<2x32xf32>
    %9 = arith.addf %6, %8 : vector<2x32xf32>
    %cst_10 = arith.constant 0.00999999977 : f32
    %10 = vector.broadcast %cst_10 : f32 to vector<2x32xf32>
    %11 = arith.mulf %10, %9 : vector<2x32xf32>
    %12 = arith.maximumf %9, %11 : vector<2x32xf32>
    %c0_11 = arith.constant 0 : index
    %c0_12 = arith.constant 0 : index
    %13 = vector.load %arg9[%c0_11, %c0_12] : memref<2x32xf32, #tpu.memory_space<vmem>>, vector<2x32xf32>
    tpu.vector_store %arg9[%c0_11, %c0_12], %12 {strides = array<i32>} : memref<2x32xf32, #tpu.memory_space<vmem>>, vector<2x32xf32>,
    %c0_13 = arith.constant 0 : index
    %c0_14 = arith.constant 0 : index
    %14 = vector.load %arg4[%c0_13, %c0_14] : memref<16x8xf32, #tpu.memory_space<vmem>>, vector<16x8xf32>
    %cst_15 = arith.constant dense<0.000000e+00> : vector<2x8xf32>
    %15 = tpu.matmul %0, %14, %cst_15 {dimension_numbers = #tpu.dot_dimension_numbers<[1], [0], [0], [1], [0, 0, 1, 1], [], []>} : vector<2x16xf32>, vector<16x8xf32>, vector<2x8xf32> -> vector<2x8xf32>
    %c0_16 = arith.constant 0 : index
    %c0_17 = arith.constant 0 : index
    %16 = vector.load %arg5[%c0_16, %c0_17] : memref<32x8xf32, #tpu.memory_space<vmem>>, vector<32x8xf32>
    %cst_18 = arith.constant dense<0.000000e+00> : vector<2x8xf32>
    %17 = tpu.matmul %1, %16, %cst_18 {dimension_numbers = #tpu.dot_dimension_numbers<[1], [0], [0], [1], [0, 0, 1, 1], [], []>} : vector<2x32xf32>, vector<32x8xf32>, vector<2x8xf32> -> vector<2x8xf32>
    %18 = arith.addf %15, %17 : vector<2x8xf32>
    %c0_19 = arith.constant 0 : index
    %c0_20 = arith.constant 0 : index
    %19 = vector.load %arg7[%c0_19, %c0_20] : memref<1x8xf32, #tpu.memory_space<vmem>>, vector<1x8xf32>
    %20 = vector.broadcast %19 : vector<1x8xf32> to vector<2x8xf32>
    %21 = arith.addf %18, %20 : vector<2x8xf32>
    %c0_21 = arith.constant 0 : index
    %c0_22 = arith.constant 0 : index
    %22 = vector.load %arg8[%c0_21, %c0_22] : memref<2x8xf32, #tpu.memory_space<vmem>>, vector<2x8xf32>
    tpu.vector_store %arg8[%c0_21, %c0_22], %21 {strides = array<i32>} : memref<2x8xf32, #tpu.memory_space<vmem>>, vector<2x8xf32>,
    return
  }
}

</mosaic_0001>

<bundles_post_ra>
// kernel: tpu_custom_call.1
= control target key start
LH: loop header
LB: loop body
LE: loop exit
PB: predicated region body
PF: predicated region fallthrough
CT: control target
= control target key end

     0   :  { %15 = vsyncpa [#allocation3], 0  ;;  %v514_v3 = vmov 0.0|0.0   ;;  %vm515_vm0 = vmmov 0   ;;  %v516_v9 = vmov 0.0   ;;  %vm115_vm1 = vcmask 130048   ;;  %s647_s0 = inlined_call_operand.vmem [shape: f32[2,16], index: 0, kind: input, shape index: {}]   ;;  %s648_s1 = inlined_call_operand.vmem [shape: f32[2,32], index: 1, kind: input, shape index: {}]   ;;  %s649_s2 = inlined_call_operand.vmem [shape: f32[16,32], index: 2, kind: input, shape index: {}]   ;;  %s650_s3 = inlined_call_operand.vmem [shape: f32[32,32], index: 3, kind: input, shape index: {}]   ;;  %s651_s4 = inlined_call_operand.vmem [shape: f32[16,8], index: 4, kind: input, shape index: {}]   ;;  %s652_s5 = inlined_call_operand.vmem [shape: f32[32,8], index: 5, kind: input, shape index: {}]   ;;  %s653_s6 = inlined_call_operand.vmem [shape: f32[1,32], index: 6, kind: input, shape index: {}]   ;;  %s654_s7 = inlined_call_operand.vmem [shape: f32[1,8], index: 7, kind: input, shape index: {}]   ;;  %s655_s8 = inlined_call_operand.hbm [shape: f32[2,8], index: 8, kind: output, shape index: {0}]   ;;  %s656_s9 = inlined_call_operand.hbm [shape: f32[2,32], index: 9, kind: output, shape index: {1}]  }
   0x1   :  { %v37_v0 = vld [vmem:[%s650_s3] sm:$0xff]  ;;  %v38_v1 = vld [vmem:[%s650_s3 + $0x8] sm:$0xff]  ;;  %443 = vmatprep.subr.bf16.mxu0 %v514_v3  ;;  %449 = vmatprep.subr.bf16.mxu1 %v514_v3  ;;  %v39_v6 = vld [vmem:[%s650_s3 + $0x10] sm:$0xff] }
   0x2   :  { %v35_v2 = vld [vmem:[%s649_s2] sm:$0xff]  ;;  %v444_v4 = vpack.c.bf16 %v38_v1, %v37_v0  ;;  %v36_v5 = vld [vmem:[%s649_s2 + $0x8] sm:$0xff]  ;;  %v40_v7 = vld [vmem:[%s650_s3 + $0x18] sm:$0xff]  ;;  %422 = vmatprep.mubr.msk.f32.mxu1 %vm515_vm0, %v516_v9  ;;  %415 = vmatprep.mubr.msk.f32.mxu0 %vm515_vm0, %v516_v9 }
   0x3   :  { %v450_v8 = vpack.c.bf16 %v36_v5, %v35_v2  ;;  %v203_v10 = vld [vmem:[%s652_s5] sm:$0xff]  ;;  %v204_v11 = vld [vmem:[%s652_s5 + $0x8] sm:$0xff]  ;;  %v447_v12 = vpack.c.bf16 %v40_v7, %v39_v6 }
   0x4   :  { %445 = vmatpush3.bf16.msra.mxu0 %v444_v4  ;;  %v33_v13 = vld [vmem:[%s647_s0] sm:$0x3]  ;;  %v453_v14 = vpack.c.bf16 %v204_v11, %v203_v10  ;;  %v202_v16 = vld [vmem:[%s651_s4 + $0x8] sm:$0xff] }
   0x5   :  { %451 = vmatpush3.bf16.msra.mxu1 %v450_v8  ;;  %446 = vmatprep.subr.bf16.mxu0 %v514_v3  ;;  %v201_v15 = vld [vmem:[%s651_s4] sm:$0xff] }
   0x6   :  { %16 = vsyncpa [#allocation5], 0  ;;  %452 = vmatprep.subr.bf16.mxu1 %v514_v3  ;;  %v205_v17 = vld [vmem:[%s652_s5 + $0x10] sm:$0xff]  ;;  %v206_v18 = vld [vmem:[%s652_s5 + $0x18] sm:$0xff]  ;;  %vm41_vm2 = vcmask 261120   ;;  %v459_v20 = vpack.c.bf16 %v202_v16, %v201_v15  ;;  %s517_s14 = smov [#allocation4]  }
   0x7   :  { %v34_v19 = vld [vmem:[%s648_s1] sm:$0x3]  ;;  %v456_v21 = vpack.c.bf16 %v206_v18, %v205_v17  ;;  %s373_s15 = sshll.u32 %s517_s14, 4  ;;  %s518_s16 = smov [#allocation2]   ;;  %vm199_vm3 = vcmask 254976   ;;  %vm355_vm4 = vcmask 58368   ;;  %s374_s15 = int_to_ptr.vmem [resolvable:$true] %s373_s15 }
   0x8   :  { %448 = vmatpush3.bf16.msra.mxu0 %v447_v12  ;;  %423 = vmatmul.mubr.msk.f32.vlgmr.msra.gmra.mrb[0].mxu1 %vm115_vm1, %v33_v13  ;;  %v387_v25 = vld [vmem:[%s653_s6] ss:$0 sm:$0xff]  ;;  %s363_s17 = sshll.u32 %s518_s16, 4  ;;  %s466_s6 = scalar_lea.vmem %s374_s15, 32  ;;  %s364_s17 = int_to_ptr.vmem [resolvable:$true] %s363_s17 }
   0x9   :  { %454 = vmatpush3.bf16.msra.mxu1 %v453_v14  ;;  %458 = vmatprep.subr.bf16.mxu0 %v514_v3  ;;  %v390_v30 = vld [vmem:[%s654_s7] ss:$0 sm:$0xff]  ;;  %p467_p0 = scmp.ne.s32.totalorder %s374_s15, %s466_s6  ;;  %p471_p1 = scmp.lt.s32.totalorder %s374_s15, %s374_s15 }
   0xa   :  { %455 = vmatprep.subr.bf16.mxu1 %v514_v3  ;;  %433 = vmatprep.mubr.msk.f32.mxu1 %vm515_vm0, %v516_v9  ;;  %p472_p2 = scmp.lt.s32.totalorder %s466_s6, %s466_s6 }
   0xb   :  { %416 = vmatmul.mubr.msk.f32.vlgmr.msra.gmra.mrb[0].mxu0 %vm41_vm2, %v34_v19 }
   0xc   :  { %460 = vmatpush3.bf16.msra.mxu0 %v459_v20  ;;  %440 = vmatprep.mubr.msk.f32.mxu0 %vm515_vm0, %v516_v9  ;;  %p473_p3 = por %p472_p2, %p471_p1 }
   0xd   :  { %457 = vmatpush3.bf16.msra.mxu1 %v456_v21 }
   0xe   :  { %p474_p4 = pnand %p473_p3, %p467_p0 }
   0xf   :  { %441 = vmatmul.mubr.msk.f32.vlgmr.msra.gmra.mrb[2].mxu0 %vm115_vm1, %v33_v13 }
  0x10   :  { %434 = vmatmul.mubr.msk.f32.vlgmr.msra.gmra.mrb[2].mxu1 %vm41_vm2, %v34_v19 }
  0xdb   :  { %v185_v22 = vpop.f32.mrb[0].mxu1 }
  0xdc   :  { %v424_v23 = vpop.f32.mrb[1].mxu1 }
  0xde   :  { %v111_v24 = vpop.f32.mrb[0].mxu0 }
  0xdf   :  { %v186_v26 = vadd.f32 %v185_v22, %v111_v24  ;;  %v417_v27 = vpop.f32.mrb[1].mxu0 }
  0xe1   :  { %v196_v28 = vadd.f32 %v387_v25, %v186_v26 }
  0xe2   :  { %v343_v29 = vpop.f32.mrb[2].mxu0 }
  0xe3   :  { %v197_v31 = vmul.f32 0.01, %v196_v28  ;;  %v273_v32 = vpop.f32.mrb[2].mxu1  ;;  %v442_v33 = vpop.f32.mrb[3].mxu0 }
  0xe4   :  { %v344_v34 = vadd.f32 %v343_v29, %v273_v32  ;;  %v435_v35 = vpop.f32.mrb[3].mxu1 }
  0xe5   :  { %v198_v36 = vmax.f32 %v196_v28, %v197_v31 }
  0xe6   :  { %v354_v37 = vadd.f32 %v390_v30, %v344_v34 }
  0xe7   :  { %200 = vst.msk [vmem:[#allocation4] sm:$0x3] %vm199_vm3, %v198_v36 }
  0xe8   :  { %356 = vst.msk [vmem:[#allocation2] sm:$0x3] %vm355_vm4, %v354_v37 }
  0xe9   :  { %477 = shalt.err (!%p474_p4)
}
  0xea   :  { %s478_s19 = scalar_lea.hbm %s656_s9, 32 }
  0xeb   :  { %p479_p5 = scmp.ne.s32.totalorder %s656_s9, %s478_s19  ;;  %p482_p6 = scmp.lt.u32.totalorder %s478_s19, %s656_s9 }
  0xed   :  { %p484_p7 = pnand %p482_p6, %p479_p5 }
  0xef   :  { %487 = shalt.err (!%p484_p7)
}
  0xf0   :  { %376 = dma.vmem_to_hbm [thread:$0]  %s374_s15, 32, %s656_s9, [#allocation5]  }
  0xf1   :  { %s488_s25 = scalar_lea.vmem %s364_s17, 32  ;;  %p493_p9 = scmp.lt.s32.totalorder %s364_s17, %s364_s17 }
  0xf2   :  { %p489_p8 = scmp.ne.s32.totalorder %s364_s17, %s488_s25  ;;  %p494_p10 = scmp.lt.s32.totalorder %s488_s25, %s488_s25 }
  0xf4   :  { %p495_p11 = por %p494_p10, %p493_p9 }
  0xf6   :  { %p496_p12 = pnand %p495_p11, %p489_p8 }
  0xf8   :  { %499 = shalt.err (!%p496_p12)
}
  0xf9   :  { %s500_s27 = scalar_lea.hbm %s655_s8, 32 }
  0xfa   :  { %p501_p13 = scmp.ne.s32.totalorder %s655_s8, %s500_s27  ;;  %p504_p0 = scmp.lt.u32.totalorder %s500_s27, %s655_s8 }
  0xfc   :  { %p506_p1 = pnand %p504_p0, %p501_p13 }
  0xfe   :  { %509 = shalt.err (!%p506_p1)
}
  0xff   :  { %366 = dma.vmem_to_hbm [thread:$0]  %s364_s17, 32, %s655_s8, [#allocation3]  }
 0x100   :  { %510 = dma.done.wait [#allocation3], 32  }
 0x101   :  { %511 = vsyncadd [#allocation3], 4294967264 }
 0x102   :  { %512 = dma.done.wait [#allocation5], 32  }
 0x103   :  { %513 = vsyncadd [#allocation5], 4294967264 }
 0x104   :  { %383 = vsyncpa [#allocation3], 1 }
 0x105   :  { %384 = vsyncpa [#allocation5], 1 }

</bundles_post_ra>
